<compile_context>
chip_gen: v7x
topology: tpu7x:2x2x1
jax: 0.10.0
libtpu: 0.0.40
codegen_flags: <defaults>
</compile_context>

<pallas_src>
import numpy as np
import jax
import jax.numpy as jnp
from jax.experimental import pallas as pl
from jax.experimental.pallas import tpu as pltpu


# ----------------------------------------------------------------------------
# Fused Pallas kernel: conv1 + ReLU + conv2 + ReLU + sliding-window embedding
# ----------------------------------------------------------------------------
def _encoder_fused_kernel(xt_ref, w1_ref, b1_ref, w2_ref, b2_ref,
                          e_ref, d_ref, a_ref, p_ref, out_ref):
    """Single grid step, batch folded into rows.

    xt_ref : (B*L,  Cin)      time-major input, row index = b*L + t
    w1_ref : (K, Cin, O1)     conv1 taps, w1_ref[k, ci, o] = w1[o, ci, k]
    b1_ref : (1, O1)
    w2_ref : (K, O1, O2)      conv2 taps, w2_ref[k, ci, o] = w2[o, ci, k]
    b2_ref : (1, O2)
    e_ref  : (K, B*L,  B*L)   block-diag shift matrices   (stride 1, pad 1)
    d_ref  : (K, B*L2, B*L)   block-diag select matrices  (stride 2, pad 1)
    a_ref  : (K, B*W,  B*L2)  block-diag sliding-window row selectors
    p_ref  : (K, O2,  K*O2)   embedding column placement  (c -> c*K + k)
    out_ref: (B*W, K*O2)      out[b*W + w, c*K + k] = y2[b, c, w + k]
    """
    f32 = jnp.float32
    K = w1_ref.shape[0]
    xt = xt_ref[...]                                            # (B*L, Cin)

    # --- conv1 (3 -> 8, stride 1, pad 1) + ReLU, time-major ---
    acc1 = None
    for k in range(K):
        t = jnp.dot(xt, w1_ref[k], preferred_element_type=f32)   # (B*L, O1)
        t = jnp.dot(e_ref[k], t, preferred_element_type=f32)     # (B*L, O1)
        acc1 = t if acc1 is None else acc1 + t
    y1 = jnp.maximum(acc1 + b1_ref[...], 0.0)                    # (B*L, O1)

    # --- conv2 (8 -> 16, stride 2, pad 1) + ReLU ---
    acc2 = None
    for k in range(K):
        t = jnp.dot(y1, w2_ref[k], preferred_element_type=f32)   # (B*L, O2)
        t = jnp.dot(d_ref[k], t, preferred_element_type=f32)     # (B*L2, O2)
        acc2 = t if acc2 is None else acc2 + t
    y2 = jnp.maximum(acc2 + b2_ref[...], 0.0)                    # (B*L2, O2)

    # --- sliding-window embedding, written once, lane axis = 48 columns ---
    acc3 = None
    for k in range(K):
        t = jnp.dot(y2, p_ref[k], preferred_element_type=f32)    # (B*L2, K*O2)
        t = jnp.dot(a_ref[k], t, preferred_element_type=f32)     # (B*W,  K*O2)
        acc3 = t if acc3 is None else acc3 + t
    out_ref[...] = acc3.astype(out_ref.dtype)


def _full_spec(shape):
    nd = len(shape)
    return pl.BlockSpec(shape, lambda i, _nd=nd: (0,) * _nd)


def _selection_matrices(B, L, L2, nwin, K, O2):
    """Host-side 0/1 matrices that encode padding, stride-2 and window stack."""
    E = np.zeros((K, B * L, B * L), np.float32)      # conv1: s = t + k - 1
    D = np.zeros((K, B * L2, B * L), np.float32)     # conv2: s = 2t + k - 1
    A = np.zeros((K, B * nwin, B * L2), np.float32)  # window: s = w + k
    P = np.zeros((K, O2, K * O2), np.float32)        # column c -> c*K + k
    for k in range(K):
        for b in range(B):
            for t in range(L):
                s = t + k - 1
                if 0 <= s < L:
                    E[k, b * L + t, b * L + s] = 1.0
            for t in range(L2):
                s = 2 * t + k - 1
                if 0 <= s < L:
                    D[k, b * L2 + t, b * L + s] = 1.0
            for w in range(nwin):
                A[k, b * nwin + w, b * L2 + w + k] = 1.0
        for c in range(O2):
            P[k, c, c * K + k] = 1.0
    return (jnp.asarray(E), jnp.asarray(D), jnp.asarray(A), jnp.asarray(P))


# ----------------------------------------------------------------------------
# Parameters (deterministic, PyTorch Conv1d-style uniform init)
# ----------------------------------------------------------------------------
def init_params(key, kernel=3, output_channel=16):
    k1, k2, k3, k4 = jax.random.split(key, 4)
    bound1 = 1.0 / (3 * kernel) ** 0.5
    bound2 = 1.0 / (8 * kernel) ** 0.5
    w1 = jax.random.uniform(k1, (8, 3, kernel), jnp.float32, -bound1, bound1)
    b1 = jax.random.uniform(k2, (8,), jnp.float32, -bound1, bound1)
    w2 = jax.random.uniform(k3, (output_channel, 8, kernel), jnp.float32, -bound2, bound2)
    b2 = jax.random.uniform(k4, (output_channel,), jnp.float32, -bound2, bound2)
    return w1, b1, w2, b2


# ----------------------------------------------------------------------------
# Forward pass: one fused pallas_call (+ trivial input transpose / reshapes)
# ----------------------------------------------------------------------------
def encoder_forward(x, params, kernel=3, output_channel=16):
    # x: (B, 3, L)  (NCW, same as PyTorch)
    w1, b1, w2, b2 = params
    B, Cin, L = x.shape
    K = kernel
    O1 = w1.shape[0]
    O2 = output_channel
    L2 = (L + 2 - K) // 2 + 1
    nwin = L2 - K + 1
    BM, BL2, BW = B * L, B * L2, B * nwin

    E, D, A, P = _selection_matrices(B, L, L2, nwin, K, O2)

    # Per-tap weights in matmul orientation: w*_t[k, ci, o] = w*[o, ci, k]
    w1t = jnp.transpose(w1, (2, 1, 0)).astype(jnp.float32)       # (K, Cin, O1)
    w2t = jnp.transpose(w2, (2, 1, 0)).astype(jnp.float32)       # (K, O1, O2)
    b1r = b1.reshape(1, O1).astype(jnp.float32)
    b2r = b2.reshape(1, O2).astype(jnp.float32)

    # Time-major input with batch folded into the matmul M dimension.
    xt = jnp.transpose(x, (0, 2, 1)).reshape(BM, Cin).astype(jnp.float32)

    out_flat = pl.pallas_call(
        _encoder_fused_kernel,
        out_shape=jax.ShapeDtypeStruct((BW, K * O2), jnp.float32),
        grid=(1,),
        in_specs=[
            _full_spec((BM, Cin)),
            _full_spec((K, Cin, O1)),
            _full_spec((1, O1)),
            _full_spec((K, O1, O2)),
            _full_spec((1, O2)),
            _full_spec((K, BM, BM)),
            _full_spec((K, BL2, BM)),
            _full_spec((K, BW, BL2)),
            _full_spec((K, O2, K * O2)),
        ],
        out_specs=_full_spec((BW, K * O2)),
        compiler_params=pltpu.CompilerParams(dimension_semantics=("arbitrary",)),
    )(xt, w1t, b1r, w2t, b2r, E, D, A, P)

    return out_flat.reshape(B, nwin, K * O2)


# ----------------------------------------------------------------------------
# Pure-JAX reference (for correctness checking)
# ----------------------------------------------------------------------------
def encoder_reference(x, params, kernel=3, output_channel=16):
    w1, b1, w2, b2 = params
    y1 = jax.lax.conv_general_dilated(
        x, w1, window_strides=(1,), padding=((1, 1),),
        dimension_numbers=("NCH", "OIH", "NCH"))
    y1 = jax.nn.relu(y1 + b1[None, :, None])
    y2 = jax.lax.conv_general_dilated(
        y1, w2, window_strides=(2,), padding=((1, 1),),
        dimension_numbers=("NCH", "OIH", "NCH"))
    y2 = jax.nn.relu(y2 + b2[None, :, None])
    L2 = y2.shape[-1]
    wins = [y2[:, :, i:i + kernel] for i in range(L2 - kernel + 1)]
    out = jnp.stack(wins, axis=1)                                 # (B, W, C, K)
    return out.reshape(out.shape[0], out.shape[1], output_channel * kernel)


if __name__ == "__main__":
    key = jax.random.PRNGKey(0)
    pkey, xkey = jax.random.split(key)
    params = init_params(pkey)

    fwd = jax.jit(encoder_forward)

    B = 2
    for L in (16, 21, 60):   # even L, odd L, and the module's default `length`
        xkey, sub = jax.random.split(xkey)
        x = jax.random.normal(sub, (B, 3, L), jnp.float32)

        out = jax.block_until_ready(fwd(x, params))
        ref = jax.block_until_ready(encoder_reference(x, params))

        L2 = (L - 1) // 2 + 1
        assert out.shape == ref.shape == (B, L2 - 2, 48), (L, out.shape, ref.shape)
        assert jnp.allclose(out, ref, atol=1e-5, rtol=1e-5), f"mismatch vs reference (L={L})"

    print("KERNEL_OK")
</pallas_src>

<mosaic_0001>
module attributes {stable_mosaic.version = 11 : i64} {
  func.func @_encoder_fused_kernel(%arg0: i32, %arg1: memref<32x3xf32, #tpu.memory_space<vmem>>, %arg2: memref<3x3x8xf32, #tpu.memory_space<vmem>>, %arg3: memref<1x8xf32, #tpu.memory_space<vmem>>, %arg4: memref<3x8x16xf32, #tpu.memory_space<vmem>>, %arg5: memref<1x16xf32, #tpu.memory_space<vmem>>, %arg6: memref<3x32x32xf32, #tpu.memory_space<vmem>>, %arg7: memref<3x16x32xf32, #tpu.memory_space<vmem>>, %arg8: memref<3x12x16xf32, #tpu.memory_space<vmem>>, %arg9: memref<3x16x48xf32, #tpu.memory_space<vmem>>, %arg10: memref<12x48xf32, #tpu.memory_space<vmem>>) attributes {dimension_semantics = [#tpu.dimension_semantics<arbitrary>], iteration_bounds = array<i64: 1>, scalar_prefetch = 0 : i64, scratch_operands = 0 : i64, tpu.core_type = #tpu.core_type<tc>, window_params = [{pipeline_mode = #tpu.pipeline_mode<synchronous>, transform_indices = @transform_0, window_bounds = array<i64: 32, 3>}, {pipeline_mode = #tpu.pipeline_mode<synchronous>, transform_indices = @transform_1, window_bounds = array<i64: 3, 3, 8>}, {pipeline_mode = #tpu.pipeline_mode<synchronous>, transform_indices = @transform_2, window_bounds = array<i64: 1, 8>}, {pipeline_mode = #tpu.pipeline_mode<synchronous>, transform_indices = @transform_3, window_bounds = array<i64: 3, 8, 16>}, {pipeline_mode = #tpu.pipeline_mode<synchronous>, transform_indices = @transform_4, window_bounds = array<i64: 1, 16>}, {pipeline_mode = #tpu.pipeline_mode<synchronous>, transform_indices = @transform_5, window_bounds = array<i64: 3, 32, 32>}, {pipeline_mode = #tpu.pipeline_mode<synchronous>, transform_indices = @transform_6, window_bounds = array<i64: 3, 16, 32>}, {pipeline_mode = #tpu.pipeline_mode<synchronous>, transform_indices = @transform_7, window_bounds = array<i64: 3, 12, 16>}, {pipeline_mode = #tpu.pipeline_mode<synchronous>, transform_indices = @transform_8, window_bounds = array<i64: 3, 16, 48>}, {pipeline_mode = #tpu.pipeline_mode<synchronous>, transform_indices = @transform_9, window_bounds = array<i64: 12, 48>}]} {
    %c0 = arith.constant 0 : index
    %c0_0 = arith.constant 0 : index
    %0 = vector.load %arg1[%c0, %c0_0] : memref<32x3xf32, #tpu.memory_space<vmem>>, vector<32x3xf32>
    %c0_1 = arith.constant 0 : index
    %c0_2 = arith.constant 0 : index
    %c0_3 = arith.constant 0 : index
    %1 = vector.load %arg2[%c0_1, %c0_2, %c0_3] : memref<3x3x8xf32, #tpu.memory_space<vmem>>, vector<1x3x8xf32>
    %2 = vector.shape_cast %1 : vector<1x3x8xf32> to vector<3x8xf32>
    %cst = arith.constant dense<0.000000e+00> : vector<32x8xf32>
    %3 = tpu.matmul %0, %2, %cst {dimension_numbers = #tpu.dot_dimension_numbers<[1], [0], [0], [1], [0, 0, 1, 1], [], []>} : vector<32x3xf32>, vector<3x8xf32>, vector<32x8xf32> -> vector<32x8xf32>
    %c0_4 = arith.constant 0 : index
    %c0_5 = arith.constant 0 : index
    %c0_6 = arith.constant 0 : index
    %4 = vector.load %arg6[%c0_4, %c0_5, %c0_6] : memref<3x32x32xf32, #tpu.memory_space<vmem>>, vector<1x32x32xf32>
    %5 = vector.shape_cast %4 : vector<1x32x32xf32> to vector<32x32xf32>
    %cst_7 = arith.constant dense<0.000000e+00> : vector<32x8xf32>
    %6 = tpu.matmul %5, %3, %cst_7 {dimension_numbers = #tpu.dot_dimension_numbers<[1], [0], [0], [1], [0, 0, 1, 1], [], []>} : vector<32x32xf32>, vector<32x8xf32>, vector<32x8xf32> -> vector<32x8xf32>
    %c1 = arith.constant 1 : index
    %c0_8 = arith.constant 0 : index
    %c0_9 = arith.constant 0 : index
    %7 = vector.load %arg2[%c1, %c0_8, %c0_9] : memref<3x3x8xf32, #tpu.memory_space<vmem>>, vector<1x3x8xf32>
    %8 = vector.shape_cast %7 : vector<1x3x8xf32> to vector<3x8xf32>
    %cst_10 = arith.constant dense<0.000000e+00> : vector<32x8xf32>
    %9 = tpu.matmul %0, %8, %cst_10 {dimension_numbers = #tpu.dot_dimension_numbers<[1], [0], [0], [1], [0, 0, 1, 1], [], []>} : vector<32x3xf32>, vector<3x8xf32>, vector<32x8xf32> -> vector<32x8xf32>
    %c1_11 = arith.constant 1 : index
    %c0_12 = arith.constant 0 : index
    %c0_13 = arith.constant 0 : index
    %10 = vector.load %arg6[%c1_11, %c0_12, %c0_13] : memref<3x32x32xf32, #tpu.memory_space<vmem>>, vector<1x32x32xf32>
    %11 = vector.shape_cast %10 : vector<1x32x32xf32> to vector<32x32xf32>
    %cst_14 = arith.constant dense<0.000000e+00> : vector<32x8xf32>
    %12 = tpu.matmul %11, %9, %cst_14 {dimension_numbers = #tpu.dot_dimension_numbers<[1], [0], [0], [1], [0, 0, 1, 1], [], []>} : vector<32x32xf32>, vector<32x8xf32>, vector<32x8xf32> -> vector<32x8xf32>
    %13 = arith.addf %6, %12 : vector<32x8xf32>
    %c2 = arith.constant 2 : index
    %c0_15 = arith.constant 0 : index
    %c0_16 = arith.constant 0 : index
    %14 = vector.load %arg2[%c2, %c0_15, %c0_16] : memref<3x3x8xf32, #tpu.memory_space<vmem>>, vector<1x3x8xf32>
    %15 = vector.shape_cast %14 : vector<1x3x8xf32> to vector<3x8xf32>
    %cst_17 = arith.constant dense<0.000000e+00> : vector<32x8xf32>
    %16 = tpu.matmul %0, %15, %cst_17 {dimension_numbers = #tpu.dot_dimension_numbers<[1], [0], [0], [1], [0, 0, 1, 1], [], []>} : vector<32x3xf32>, vector<3x8xf32>, vector<32x8xf32> -> vector<32x8xf32>
    %c2_18 = arith.constant 2 : index
    %c0_19 = arith.constant 0 : index
    %c0_20 = arith.constant 0 : index
    %17 = vector.load %arg6[%c2_18, %c0_19, %c0_20] : memref<3x32x32xf32, #tpu.memory_space<vmem>>, vector<1x32x32xf32>
    %18 = vector.shape_cast %17 : vector<1x32x32xf32> to vector<32x32xf32>
    %cst_21 = arith.constant dense<0.000000e+00> : vector<32x8xf32>
    %19 = tpu.matmul %18, %16, %cst_21 {dimension_numbers = #tpu.dot_dimension_numbers<[1], [0], [0], [1], [0, 0, 1, 1], [], []>} : vector<32x32xf32>, vector<32x8xf32>, vector<32x8xf32> -> vector<32x8xf32>
    %20 = arith.addf %13, %19 : vector<32x8xf32>
    %c0_22 = arith.constant 0 : index
    %c0_23 = arith.constant 0 : index
    %21 = vector.load %arg3[%c0_22, %c0_23] : memref<1x8xf32, #tpu.memory_space<vmem>>, vector<1x8xf32>
    %22 = vector.broadcast %21 : vector<1x8xf32> to vector<32x8xf32>
    %23 = arith.addf %20, %22 : vector<32x8xf32>
    %cst_24 = arith.constant 0.000000e+00 : f32
    %24 = vector.broadcast %cst_24 : f32 to vector<32x8xf32>
    %25 = arith.maximumf %23, %24 : vector<32x8xf32>
    %c0_25 = arith.constant 0 : index
    %c0_26 = arith.constant 0 : index
    %c0_27 = arith.constant 0 : index
    %26 = vector.load %arg4[%c0_25, %c0_26, %c0_27] : memref<3x8x16xf32, #tpu.memory_space<vmem>>, vector<1x8x16xf32>
    %27 = vector.shape_cast %26 : vector<1x8x16xf32> to vector<8x16xf32>
    %cst_28 = arith.constant dense<0.000000e+00> : vector<32x16xf32>
    %28 = tpu.matmul %25, %27, %cst_28 {dimension_numbers = #tpu.dot_dimension_numbers<[1], [0], [0], [1], [0, 0, 1, 1], [], []>} : vector<32x8xf32>, vector<8x16xf32>, vector<32x16xf32> -> vector<32x16xf32>
    %c0_29 = arith.constant 0 : index
    %c0_30 = arith.constant 0 : index
    %c0_31 = arith.constant 0 : index
    %29 = vector.load %arg7[%c0_29, %c0_30, %c0_31] : memref<3x16x32xf32, #tpu.memory_space<vmem>>, vector<1x16x32xf32>
    %30 = vector.shape_cast %29 : vector<1x16x32xf32> to vector<16x32xf32>
    %cst_32 = arith.constant dense<0.000000e+00> : vector<16x16xf32>
    %31 = tpu.matmul %30, %28, %cst_32 {dimension_numbers = #tpu.dot_dimension_numbers<[1], [0], [0], [1], [0, 0, 1, 1], [], []>} : vector<16x32xf32>, vector<32x16xf32>, vector<16x16xf32> -> vector<16x16xf32>
    %c1_33 = arith.constant 1 : index
    %c0_34 = arith.constant 0 : index
    %c0_35 = arith.constant 0 : index
    %32 = vector.load %arg4[%c1_33, %c0_34, %c0_35] : memref<3x8x16xf32, #tpu.memory_space<vmem>>, vector<1x8x16xf32>
    %33 = vector.shape_cast %32 : vector<1x8x16xf32> to vector<8x16xf32>
    %cst_36 = arith.constant dense<0.000000e+00> : vector<32x16xf32>
    %34 = tpu.matmul %25, %33, %cst_36 {dimension_numbers = #tpu.dot_dimension_numbers<[1], [0], [0], [1], [0, 0, 1, 1], [], []>} : vector<32x8xf32>, vector<8x16xf32>, vector<32x16xf32> -> vector<32x16xf32>
    %c1_37 = arith.constant 1 : index
    %c0_38 = arith.constant 0 : index
    %c0_39 = arith.constant 0 : index
    %35 = vector.load %arg7[%c1_37, %c0_38, %c0_39] : memref<3x16x32xf32, #tpu.memory_space<vmem>>, vector<1x16x32xf32>
    %36 = vector.shape_cast %35 : vector<1x16x32xf32> to vector<16x32xf32>
    %cst_40 = arith.constant dense<0.000000e+00> : vector<16x16xf32>
    %37 = tpu.matmul %36, %34, %cst_40 {dimension_numbers = #tpu.dot_dimension_numbers<[1], [0], [0], [1], [0, 0, 1, 1], [], []>} : vector<16x32xf32>, vector<32x16xf32>, vector<16x16xf32> -> vector<16x16xf32>
    %38 = arith.addf %31, %37 : vector<16x16xf32>
    %c2_41 = arith.constant 2 : index
    %c0_42 = arith.constant 0 : index
    %c0_43 = arith.constant 0 : index
    %39 = vector.load %arg4[%c2_41, %c0_42, %c0_43] : memref<3x8x16xf32, #tpu.memory_space<vmem>>, vector<1x8x16xf32>
    %40 = vector.shape_cast %39 : vector<1x8x16xf32> to vector<8x16xf32>
    %cst_44 = arith.constant dense<0.000000e+00> : vector<32x16xf32>
    %41 = tpu.matmul %25, %40, %cst_44 {dimension_numbers = #tpu.dot_dimension_numbers<[1], [0], [0], [1], [0, 0, 1, 1], [], []>} : vector<32x8xf32>, vector<8x16xf32>, vector<32x16xf32> -> vector<32x16xf32>
    %c2_45 = arith.constant 2 : index
    %c0_46 = arith.constant 0 : index
    %c0_47 = arith.constant 0 : index
    %42 = vector.load %arg7[%c2_45, %c0_46, %c0_47] : memref<3x16x32xf32, #tpu.memory_space<vmem>>, vector<1x16x32xf32>
    %43 = vector.shape_cast %42 : vector<1x16x32xf32> to vector<16x32xf32>
    %cst_48 = arith.constant dense<0.000000e+00> : vector<16x16xf32>
    %44 = tpu.matmul %43, %41, %cst_48 {dimension_numbers = #tpu.dot_dimension_numbers<[1], [0], [0], [1], [0, 0, 1, 1], [], []>} : vector<16x32xf32>, vector<32x16xf32>, vector<16x16xf32> -> vector<16x16xf32>
    %45 = arith.addf %38, %44 : vector<16x16xf32>
    %c0_49 = arith.constant 0 : index
    %c0_50 = arith.constant 0 : index
    %46 = vector.load %arg5[%c0_49, %c0_50] : memref<1x16xf32, #tpu.memory_space<vmem>>, vector<1x16xf32>
    %47 = vector.broadcast %46 : vector<1x16xf32> to vector<16x16xf32>
    %48 = arith.addf %45, %47 : vector<16x16xf32>
    %cst_51 = arith.constant 0.000000e+00 : f32
    %49 = vector.broadcast %cst_51 : f32 to vector<16x16xf32>
    %50 = arith.maximumf %48, %49 : vector<16x16xf32>
    %c0_52 = arith.constant 0 : index
    %c0_53 = arith.constant 0 : index
    %c0_54 = arith.constant 0 : index
    %51 = vector.load %arg9[%c0_52, %c0_53, %c0_54] : memref<3x16x48xf32, #tpu.memory_space<vmem>>, vector<1x16x48xf32>
    %52 = vector.shape_cast %51 : vector<1x16x48xf32> to vector<16x48xf32>
    %cst_55 = arith.constant dense<0.000000e+00> : vector<16x48xf32>
    %53 = tpu.matmul %50, %52, %cst_55 {dimension_numbers = #tpu.dot_dimension_numbers<[1], [0], [0], [1], [0, 0, 1, 1], [], []>} : vector<16x16xf32>, vector<16x48xf32>, vector<16x48xf32> -> vector<16x48xf32>
    %c0_56 = arith.constant 0 : index
    %c0_57 = arith.constant 0 : index
    %c0_58 = arith.constant 0 : index
    %54 = vector.load %arg8[%c0_56, %c0_57, %c0_58] : memref<3x12x16xf32, #tpu.memory_space<vmem>>, vector<1x12x16xf32>
    %55 = vector.shape_cast %54 : vector<1x12x16xf32> to vector<12x16xf32>
    %cst_59 = arith.constant dense<0.000000e+00> : vector<12x48xf32>
    %56 = tpu.matmul %55, %53, %cst_59 {dimension_numbers = #tpu.dot_dimension_numbers<[1], [0], [0], [1], [0, 0, 1, 1], [], []>} : vector<12x16xf32>, vector<16x48xf32>, vector<12x48xf32> -> vector<12x48xf32>
    %c1_60 = arith.constant 1 : index
    %c0_61 = arith.constant 0 : index
    %c0_62 = arith.constant 0 : index
    %57 = vector.load %arg9[%c1_60, %c0_61, %c0_62] : memref<3x16x48xf32, #tpu.memory_space<vmem>>, vector<1x16x48xf32>
    %58 = vector.shape_cast %57 : vector<1x16x48xf32> to vector<16x48xf32>
    %cst_63 = arith.constant dense<0.000000e+00> : vector<16x48xf32>
    %59 = tpu.matmul %50, %58, %cst_63 {dimension_numbers = #tpu.dot_dimension_numbers<[1], [0], [0], [1], [0, 0, 1, 1], [], []>} : vector<16x16xf32>, vector<16x48xf32>, vector<16x48xf32> -> vector<16x48xf32>
    %c1_64 = arith.constant 1 : index
    %c0_65 = arith.constant 0 : index
    %c0_66 = arith.constant 0 : index
    %60 = vector.load %arg8[%c1_64, %c0_65, %c0_66] : memref<3x12x16xf32, #tpu.memory_space<vmem>>, vector<1x12x16xf32>
    %61 = vector.shape_cast %60 : vector<1x12x16xf32> to vector<12x16xf32>
    %cst_67 = arith.constant dense<0.000000e+00> : vector<12x48xf32>
    %62 = tpu.matmul %61, %59, %cst_67 {dimension_numbers = #tpu.dot_dimension_numbers<[1], [0], [0], [1], [0, 0, 1, 1], [], []>} : vector<12x16xf32>, vector<16x48xf32>, vector<12x48xf32> -> vector<12x48xf32>
    %63 = arith.addf %56, %62 : vector<12x48xf32>
    %c2_68 = arith.constant 2 : index
    %c0_69 = arith.constant 0 : index
    %c0_70 = arith.constant 0 : index
    %64 = vector.load %arg9[%c2_68, %c0_69, %c0_70] : memref<3x16x48xf32, #tpu.memory_space<vmem>>, vector<1x16x48xf32>
    %65 = vector.shape_cast %64 : vector<1x16x48xf32> to vector<16x48xf32>
    %cst_71 = arith.constant dense<0.000000e+00> : vector<16x48xf32>
    %66 = tpu.matmul %50, %65, %cst_71 {dimension_numbers = #tpu.dot_dimension_numbers<[1], [0], [0], [1], [0, 0, 1, 1], [], []>} : vector<16x16xf32>, vector<16x48xf32>, vector<16x48xf32> -> vector<16x48xf32>
    %c2_72 = arith.constant 2 : index
    %c0_73 = arith.constant 0 : index
    %c0_74 = arith.constant 0 : index
    %67 = vector.load %arg8[%c2_72, %c0_73, %c0_74] : memref<3x12x16xf32, #tpu.memory_space<vmem>>, vector<1x12x16xf32>
    %68 = vector.shape_cast %67 : vector<1x12x16xf32> to vector<12x16xf32>
    %cst_75 = arith.constant dense<0.000000e+00> : vector<12x48xf32>
    %69 = tpu.matmul %68, %66, %cst_75 {dimension_numbers = #tpu.dot_dimension_numbers<[1], [0], [0], [1], [0, 0, 1, 1], [], []>} : vector<12x16xf32>, vector<16x48xf32>, vector<12x48xf32> -> vector<12x48xf32>
    %70 = arith.addf %63, %69 : vector<12x48xf32>
    %c0_76 = arith.constant 0 : index
    %c0_77 = arith.constant 0 : index
    %71 = vector.load %arg10[%c0_76, %c0_77] : memref<12x48xf32, #tpu.memory_space<vmem>>, vector<12x48xf32>
    tpu.vector_store %arg10[%c0_76, %c0_77], %70 {strides = array<i32>} : memref<12x48xf32, #tpu.memory_space<vmem>>, vector<12x48xf32>,
    return
  }
  func.func @transform_0(%arg0: i32) -> (i32, i32) {
    %c0_i32 = arith.constant 0 : i32
    %c0_i32_0 = arith.constant 0 : i32
    %c0_i32_1 = arith.constant 0 : i32
    return %c0_i32, %c0_i32_0 : i32, i32
  }
  func.func @transform_1(%arg0: i32) -> (i32, i32, i32) {
    %c0_i32 = arith.constant 0 : i32
    %c0_i32_0 = arith.constant 0 : i32
    %c0_i32_1 = arith.constant 0 : i32
    %c0_i32_2 = arith.constant 0 : i32
    return %c0_i32, %c0_i32_0, %c0_i32_1 : i32, i32, i32
  }
  func.func @transform_2(%arg0: i32) -> (i32, i32) {
    %c0_i32 = arith.constant 0 : i32
    %c0_i32_0 = arith.constant 0 : i32
    %c0_i32_1 = arith.constant 0 : i32
    return %c0_i32, %c0_i32_0 : i32, i32
  }
  func.func @transform_3(%arg0: i32) -> (i32, i32, i32) {
    %c0_i32 = arith.constant 0 : i32
    %c0_i32_0 = arith.constant 0 : i32
    %c0_i32_1 = arith.constant 0 : i32
    %c0_i32_2 = arith.constant 0 : i32
    return %c0_i32, %c0_i32_0, %c0_i32_1 : i32, i32, i32
  }
  func.func @transform_4(%arg0: i32) -> (i32, i32) {
    %c0_i32 = arith.constant 0 : i32
    %c0_i32_0 = arith.constant 0 : i32
    %c0_i32_1 = arith.constant 0 : i32
    return %c0_i32, %c0_i32_0 : i32, i32
  }
  func.func @transform_5(%arg0: i32) -> (i32, i32, i32) {
    %c0_i32 = arith.constant 0 : i32
    %c0_i32_0 = arith.constant 0 : i32
    %c0_i32_1 = arith.constant 0 : i32
    %c0_i32_2 = arith.constant 0 : i32
    return %c0_i32, %c0_i32_0, %c0_i32_1 : i32, i32, i32
  }
  func.func @transform_6(%arg0: i32) -> (i32, i32, i32) {
    %c0_i32 = arith.constant 0 : i32
    %c0_i32_0 = arith.constant 0 : i32
    %c0_i32_1 = arith.constant 0 : i32
    %c0_i32_2 = arith.constant 0 : i32
    return %c0_i32, %c0_i32_0, %c0_i32_1 : i32, i32, i32
  }
  func.func @transform_7(%arg0: i32) -> (i32, i32, i32) {
    %c0_i32 = arith.constant 0 : i32
    %c0_i32_0 = arith.constant 0 : i32
    %c0_i32_1 = arith.constant 0 : i32
    %c0_i32_2 = arith.constant 0 : i32
    return %c0_i32, %c0_i32_0, %c0_i32_1 : i32, i32, i32
  }
  func.func @transform_8(%arg0: i32) -> (i32, i32, i32) {
    %c0_i32 = arith.constant 0 : i32
    %c0_i32_0 = arith.constant 0 : i32
    %c0_i32_1 = arith.constant 0 : i32
    %c0_i32_2 = arith.constant 0 : i32
    return %c0_i32, %c0_i32_0, %c0_i32_1 : i32, i32, i32
  }
  func.func @transform_9(%arg0: i32) -> (i32, i32) {
    %c0_i32 = arith.constant 0 : i32
    %c0_i32_0 = arith.constant 0 : i32
    %c0_i32_1 = arith.constant 0 : i32
    return %c0_i32, %c0_i32_0 : i32, i32
  }
}

</mosaic_0001>

<bundles_post_ra>
// kernel: encoder_forward.1
= control target key start
LH: loop header
LB: loop body
LE: loop exit
PB: predicated region body
PF: predicated region fallthrough
CT: control target
= control target key end

     0   :  { %14 = vsyncpa [#allocation3], 0  ;;  %s2517_s0 = inlined_call_operand.vmem [shape: f32[32,3], index: 0, kind: input, shape index: {}]   ;;  %s2518_s1 = inlined_call_operand.vmem [shape: f32[3,3,8], index: 1, kind: input, shape index: {}]   ;;  %s2519_s2 = inlined_call_operand.vmem [shape: f32[1,8], index: 2, kind: input, shape index: {}]   ;;  %s2520_s3 = inlined_call_operand.hbm [shape: f32[3,8,16], index: 3, kind: input, shape index: {}]   ;;  %s2521_s4 = inlined_call_operand.vmem [shape: f32[1,16], index: 4, kind: input, shape index: {}]   ;;  %s2522_s5 = inlined_call_operand.vmem [shape: f32[3,32,32], index: 5, kind: input, shape index: {}]   ;;  %s2523_s6 = inlined_call_operand.hbm [shape: f32[3,16,32], index: 6, kind: input, shape index: {}]   ;;  %s2524_s7 = inlined_call_operand.hbm [shape: f32[3,12,16], index: 7, kind: input, shape index: {}]   ;;  %s2525_s8 = inlined_call_operand.hbm [shape: f32[3,16,48], index: 8, kind: input, shape index: {}]   ;;  %s2526_s9 = inlined_call_operand.vmem [shape: f32[12,48], index: 9, kind: output, shape index: {}]  }
   0x1   :  { %15 = vsyncpa [#allocation5], 0 }
   0x2   :  { %16 = vsyncpa [#allocation8], 0  ;;  %s2258_s30 = smov [#allocation4]   ;;  %s2259_s11 = smov [#allocation2]  }
   0x3   :  { %s44_s10 = sshll.u32 %s2258_s30, 4  ;;  %s28_s12 = sshll.u32 %s2259_s11, 4  ;;  %s45_s10 = int_to_ptr.vmem [resolvable:$true] %s44_s10  ;;  %s2314_s12 = int_to_ptr.vmem [resolvable:$true] %s28_s12 }
   0x4   :  { %s2164_s15 = scalar_lea.hbm %s2523_s6, 768 }
   0x5   :  { %p2165_p0 = scmp.ne.s32.totalorder %s2523_s6, %s2164_s15  ;;  %p2168_p1 = scmp.lt.u32.totalorder %s2164_s15, %s2523_s6 }
   0x7   :  { %p2170_p2 = pnand %p2168_p1, %p2165_p0 }
   0x9   :  { %2173 = shalt.err (!%p2170_p2)
}
   0xa   :  { %s2174_s20 = scalar_lea.vmem %s45_s10, 768  ;;  %p2179_p4 = scmp.lt.s32.totalorder %s45_s10, %s45_s10 }
   0xb   :  { %p2175_p3 = scmp.ne.s32.totalorder %s45_s10, %s2174_s20  ;;  %p2180_p5 = scmp.lt.s32.totalorder %s2174_s20, %s2174_s20 }
   0xd   :  { %p2181_p6 = por %p2180_p5, %p2179_p4 }
   0xf   :  { %p2182_p7 = pnand %p2181_p6, %p2175_p3 }
  0x11   :  { %2185 = shalt.err (!%p2182_p7)
}
  0x12   :  { %s2260_s21 = smov 128   ;;  %s2261_s22 = smov 8  }
  0x13   :  { %50 = dma.hbm_to_vmem [thread:$0]  %s2523_s6, 768, %s45_s10, [#allocation5], %s2260_s21, %s2260_s21, %s2261_s22  }
  0x14   :  { %s2186_s27 = scalar_lea.hbm %s2520_s3, 384 }
  0x15   :  { %p2187_p8 = scmp.ne.s32.totalorder %s2520_s3, %s2186_s27  ;;  %p2190_p9 = scmp.lt.u32.totalorder %s2186_s27, %s2520_s3 }
  0x17   :  { %p2192_p10 = pnand %p2190_p9, %p2187_p8 }
  0x19   :  { %2195 = shalt.err (!%p2192_p10)
}
  0x1a   :  { %s2196_s13 = scalar_lea.vmem %s2314_s12, 384  ;;  %p2201_p12 = scmp.lt.s32.totalorder %s2314_s12, %s2314_s12 }
  0x1b   :  { %p2197_p11 = scmp.ne.s32.totalorder %s2314_s12, %s2196_s13  ;;  %p2202_p13 = scmp.lt.s32.totalorder %s2196_s13, %s2196_s13 }
  0x1d   :  { %p2203_p0 = por %p2202_p13, %p2201_p12 }
  0x1f   :  { %p2204_p1 = pnand %p2203_p0, %p2197_p11 }
  0x21   :  { %2207 = shalt.err (!%p2204_p1)
}
  0x22   :  { %34 = dma.hbm_to_vmem [thread:$0]  %s2520_s3, 384, %s2314_s12, [#allocation3], %s2260_s21, %s2260_s21, %s2261_s22  }
  0x23   :  { %s2262_s14 = smov [#allocation6]   ;;  %s2263_s16 = smov [#allocation7]  }
  0x24   :  { %s56_s15 = sshll.u32 %s2262_s14, 4  ;;  %s68_s17 = sshll.u32 %s2263_s16, 4  ;;  %s57_s15 = int_to_ptr.vmem [resolvable:$true] %s56_s15  ;;  %s2351_s17 = int_to_ptr.vmem [resolvable:$true] %s68_s17 }
  0x25   :  { %s2208_s20 = scalar_lea.hbm %s2524_s7, 768 }
  0x26   :  { %p2209_p2 = scmp.ne.s32.totalorder %s2524_s7, %s2208_s20  ;;  %p2212_p3 = scmp.lt.u32.totalorder %s2208_s20, %s2524_s7 }
  0x28   :  { %p2214_p4 = pnand %p2212_p3, %p2209_p2 }
  0x2a   :  { %2217 = shalt.err (!%p2214_p4)
}
  0x2b   :  { %s2218_s3 = scalar_lea.vmem %s57_s15, 768  ;;  %p2223_p6 = scmp.lt.s32.totalorder %s57_s15, %s57_s15 }
  0x2c   :  { %p2219_p5 = scmp.ne.s32.totalorder %s57_s15, %s2218_s3  ;;  %p2224_p7 = scmp.lt.s32.totalorder %s2218_s3, %s2218_s3 }
  0x2e   :  { %p2225_p8 = por %p2224_p7, %p2223_p6 }
  0x30   :  { %p2226_p9 = pnand %p2225_p8, %p2219_p5 }
  0x32   :  { %2229 = shalt.err (!%p2226_p9)
}
  0x33   :  { %62 = dma.hbm_to_vmem [thread:$0]  %s2524_s7, 768, %s57_s15, [#allocation5], %s2260_s21, %s2260_s21, %s2261_s22  }
  0x34   :  { %s2230_s30 = scalar_lea.hbm %s2525_s8, 768 }
  0x35   :  { %p2231_p10 = scmp.ne.s32.totalorder %s2525_s8, %s2230_s30  ;;  %p2234_p11 = scmp.lt.u32.totalorder %s2230_s30, %s2525_s8 }
  0x37   :  { %p2236_p12 = pnand %p2234_p11, %p2231_p10 }
  0x39   :  { %2239 = shalt.err (!%p2236_p12)
}
  0x3a   :  { %s2240_s14 = scalar_lea.vmem %s2351_s17, 768  ;;  %p2245_p0 = scmp.lt.s32.totalorder %s2351_s17, %s2351_s17 }
  0x3b   :  { %p2241_p13 = scmp.ne.s32.totalorder %s2351_s17, %s2240_s14  ;;  %p2246_p1 = scmp.lt.s32.totalorder %s2240_s14, %s2240_s14 }
  0x3d   :  { %p2247_p2 = por %p2246_p1, %p2245_p0 }
  0x3f   :  { %p2248_p3 = pnand %p2247_p2, %p2241_p13 }
  0x41   :  { %2251 = shalt.err (!%p2248_p3)
}
  0x42   :  { %74 = dma.hbm_to_vmem [thread:$0]  %s2525_s8, 768, %s2351_s17, [#allocation8], %s2260_s21, %s2260_s21, %s2261_s22  }
  0x43   :  { %2252 = dma.done.wait [#allocation3], 384  }
  0x44   :  { %2253 = vsyncadd [#allocation3], 4294966912 }
  0x45   :  { %2254 = dma.done.wait [#allocation5], 1536  }
  0x46   :  { %2255 = vsyncadd [#allocation5], 4294965760 }
  0x47   :  { %2256 = dma.done.wait [#allocation8], 768  }
  0x48   :  { %2257 = vsyncadd [#allocation8], 4294966528  ;;  %vm105_vm0 = vcmask 1042432   ;;  %vm92_vm1 = vcmask 23552   ;;  %v1745_v0 = vld [vmem:[%s2518_s1 + $0x4] sm:$0x7] }
  0x49   :  { %v87_v1 = vld [vmem:[%s2517_s0] sm:$0xff]  ;;  %v88_v2 = vld [vmem:[%s2517_s0 + $0x8] sm:$0xff]  ;;  %1913 = vmatprep.subr.msk.mxu1 %vm105_vm0, %v1745_v0  ;;  %v89_v3 = vld [vmem:[%s2517_s0 + $0x10] sm:$0xff]  ;;  %vm293_vm2 = vcmask 261120   ;;  %vm700_vm3 = vcmask 64512   ;;  %vm1238_vm4 = vcmask 130048  }
  0x4a   :  { %1915 = vmatprep.mubr.msk.f32.mxu1 %vm92_vm1, %v87_v1  ;;  %v91_v4 = vld [vmem:[%s2518_s1] sm:$0x7]  ;;  %1914 = vmatpush3.msk.msra.mxu1 %vm105_vm0, %v1745_v0  ;;  %v1763_v5 = vld [vmem:[%s2518_s1 + $0x8] sm:$0x7]  ;;  %v90_v6 = vld [vmem:[%s2517_s0 + $0x18] sm:$0xff]  ;;  %vm1731_vm5 = vcmask 388096  }
  0x4b   :  { %1905 = vmatprep.subr.msk.mxu0 %vm105_vm0, %v91_v4  ;;  %1916 = vmatmul.mubr.msk.f32.vlgmr.msra.gmra.mrb[0].mxu1 %vm92_vm1, %v88_v2  ;;  %v1751_v7 = vld [vmem:[%s2522_s5 + $0x20] sm:$0xff]  ;;  %v1752_v22 = vld [vmem:[%s2522_s5 + $0x28] sm:$0xff]  ;;  %v1753_v24 = vld [vmem:[%s2522_s5 + $0x30] sm:$0xff]  ;;  %vm1729_vm6 = vcmask 392192  }
  0x4c   :  { %1906 = vmatpush3.msk.msra.mxu0 %vm105_vm0, %v91_v4  ;;  %1918 = vmatprep.mubr.msk.f32.mxu1 %vm92_vm1, %v89_v3  ;;  %v699_v8 = vld [vmem:[#allocation2] sm:$0xff]  ;;  %v1754_v27 = vld [vmem:[%s2522_s5 + $0x38] sm:$0xff]  ;;  %v195_v31 = vld [vmem:[%s2522_s5 + $0x8] sm:$0xff] }
  0x4d   :  { %1907 = vmatprep.mubr.msk.f32.mxu0 %vm92_vm1, %v87_v1  ;;  %1949 = vmatprep.subr.msk.mxu1 %vm105_vm0, %v1763_v5  ;;  %v194_v29 = vld [vmem:[%s2522_s5] sm:$0xff]  ;;  %v196_v32 = vld [vmem:[%s2522_s5 + $0x10] sm:$0xff]  ;;  %v197_v33 = vld [vmem:[%s2522_s5 + $0x18] sm:$0xff] }
  0x4e   :  { %1908 = vmatmul.mubr.msk.f32.vlgmr.msra.gmra.mrb[0].mxu0 %vm92_vm1, %v88_v2  ;;  %1950 = vmatpush3.msk.msra.mxu1 %vm105_vm0, %v1763_v5  ;;  %v1769_v34 = vld [vmem:[%s2522_s5 + $0x40] sm:$0xff]  ;;  %v1770_v35 = vld [vmem:[%s2522_s5 + $0x48] sm:$0xff]  ;;  %v1771_v36 = vld [vmem:[%s2522_s5 + $0x50] sm:$0xff] }
  0x4f   :  { %1910 = vmatprep.mubr.msk.f32.mxu0 %vm92_vm1, %v89_v3  ;;  %1919 = vmatmul.mubr.msk.f32.gmra.mrb[2].mxu1 %vm92_vm1, %v90_v6  ;;  %v1772_v37 = vld [vmem:[%s2522_s5 + $0x58] sm:$0xff]  ;;  %v801_v38 = vld [vmem:[#allocation2 + $0x8] sm:$0xff]  ;;  %v1777_v39 = vld [vmem:[%s2519_s2] ss:$0 sm:$0xff] }
  0x50   :  { %1951 = vmatprep.mubr.msk.f32.mxu1 %vm92_vm1, %v87_v1  ;;  %1971 = vmatprep.subr.mxu1 %v699_v8  ;;  %v1053_v50 = vld [vmem:[#allocation2 + $0x10] sm:$0xff]  ;;  %v888_v53 = vld [vmem:[#allocation4 + $0x10] sm:$0xff]  ;;  %v1236_v54 = vld [vmem:[#allocation7] sm:$0xff] }
  0x51   :  { %v1237_v55 = vld [vmem:[#allocation7 + $0x8] sm:$0xff] }
  0x52   :  { %1911 = vmatmul.mubr.msk.f32.gmra.mrb[2].mxu0 %vm92_vm1, %v90_v6  ;;  %v2118_v56 = vpack.c.bf16 %v1237_v55, %v1236_v54 }
  0x53   :  { %1952 = vmatmul.mubr.msk.f32.vlgmr.msra.gmra.mrb[4].mxu1 %vm92_vm1, %v88_v2  ;;  %1929 = vmatprep.mubr.msk.f32.mxu0 %vm293_vm2, %v1751_v7  ;;  %v889_v7 = vld [vmem:[#allocation4 + $0x18] sm:$0xff] }
  0x54   :  { %1954 = vmatprep.mubr.msk.f32.mxu1 %vm92_vm1, %v89_v3  ;;  %1972 = vmatpush3.msra.mxu1 %v699_v8 }
  0x55   :  { %1979 = vmatprep.subr.mxu1 %v801_v38 }
  0x57   :  { %1955 = vmatmul.mubr.msk.f32.gmra.mrb[6].mxu1 %vm92_vm1, %v90_v6 }
 0x11e   :  { %v1917_v9 = vpop.f32.mrb[0].mxu1 }
 0x11f   :  { %v269_v10 = vpop.f32.mrb[1].mxu1 }
 0x120   :  { %v2070_v11 = vpack.c.bf16 %v1917_v9, %v269_v10  ;;  %v798_v9 = vld [vmem:[#allocation4] sm:$0xff] }
 0x121   :  { %v1909_v12 = vpop.f32.mrb[0].mxu0 }
 0x122   :  { %v175_v13 = vpop.f32.mrb[1].mxu0  ;;  %v1920_v14 = vpop.f32.mrb[2].mxu1  ;;  %2071 = vmatprep.subr.bf16.mxu0 %v2070_v11 }
 0x123   :  { %v2078_v15 = vpack.c.bf16 %v1909_v12, %v175_v13  ;;  %v279_v16 = vpop.f32.mrb[3].mxu1  ;;  %2073 = vmatpush3.bf16.msra.mxu0 %v2070_v11  ;;  %v799_v13 = vld [vmem:[#allocation4 + $0x8] sm:$0xff] }
 0x124   :  { %v2074_v17 = vpack.c.bf16 %v1920_v14, %v279_v16  ;;  %v1140_v14 = vld [vmem:[#allocation4 + $0x20] sm:$0xff] }
 0x125   :  { %v1912_v18 = vpop.f32.mrb[2].mxu0  ;;  %v1566_v16 = vld [vmem:[#allocation7 + $0x20] sm:$0xff] }
 0x126   :  { %v185_v19 = vpop.f32.mrb[3].mxu0  ;;  %2075 = vmatprep.subr.bf16.mxu0 %v2074_v17  ;;  %v1953_v21 = vpop.f32.mrb[4].mxu1 }
 0x127   :  { %v2082_v20 = vpack.c.bf16 %v1912_v18, %v185_v19  ;;  %2077 = vmatpush3.bf16.msra.mxu0 %v2074_v17  ;;  %v559_v23 = vpop.f32.mrb[5].mxu1  ;;  %v1567_v17 = vld [vmem:[#allocation7 + $0x28] sm:$0xff]  ;;  %v1323_v19 = vld [vmem:[#allocation7 + $0x10] sm:$0xff] }
 0x128   :  { %2079 = vmatprep.subr.bf16.mxu0 %v2078_v15  ;;  %v2086_v25 = vpack.c.bf16 %v1953_v21, %v559_v23  ;;  %v2134_v18 = vpack.c.bf16 %v1567_v17, %v1566_v16 }
 0x12a   :  { %1930 = vmatmul.mubr.msk.f32.vlgmr.msra.gmra.mrb[4].mxu0 %vm293_vm2, %v1752_v22  ;;  %v1956_v26 = vpop.f32.mrb[6].mxu1  ;;  %v1796_v22 = vld [vmem:[%s2521_s4] ss:$0 sm:$0xff] }
 0x12b   :  { %2081 = vmatpush3.bf16.msra.mxu0 %v2078_v15  ;;  %1932 = vmatprep.mubr.msk.f32.mxu0 %vm293_vm2, %v1753_v24  ;;  %v569_v28 = vpop.f32.mrb[7].mxu1  ;;  %v1141_v15 = vld [vmem:[#allocation4 + $0x28] sm:$0xff] }
 0x12c   :  { %2083 = vmatprep.subr.bf16.mxu0 %v2082_v20  ;;  %v2090_v30 = vpack.c.bf16 %v1956_v26, %v569_v28 }
 0x12e   :  { %1933 = vmatmul.mubr.msk.f32.gmra.mrb[6].mxu0 %vm293_vm2, %v1754_v27 }
 0x12f   :  { %2085 = vmatpush3.bf16.msra.mxu0 %v2082_v20  ;;  %1943 = vmatprep.mubr.msk.f32.mxu0 %vm293_vm2, %v194_v29  ;;  %v1324_v20 = vld [vmem:[#allocation7 + $0x18] sm:$0xff]  ;;  %v1401_v29 = vld [vmem:[#allocation6 + $0x10] sm:$0xff] }
 0x130   :  { %2087 = vmatprep.subr.bf16.mxu0 %v2086_v25  ;;  %v2122_v21 = vpack.c.bf16 %v1324_v20, %v1323_v19 }
 0x132   :  { %1944 = vmatmul.mubr.msk.f32.vlgmr.msra.gmra.mrb[4].mxu0 %vm293_vm2, %v195_v31 }
 0x133   :  { %2089 = vmatpush3.bf16.msra.mxu0 %v2086_v25  ;;  %1946 = vmatprep.mubr.msk.f32.mxu0 %vm293_vm2, %v196_v32 }
 0x134   :  { %2091 = vmatprep.subr.bf16.mxu0 %v2090_v30 }
 0x136   :  { %1947 = vmatmul.mubr.msk.f32.gmra.mrb[6].mxu0 %vm293_vm2, %v197_v33 }
 0x137   :  { %2093 = vmatpush3.bf16.msra.mxu0 %v2090_v30  ;;  %1965 = vmatprep.mubr.msk.f32.mxu0 %vm293_vm2, %v1769_v34 }
 0x13a   :  { %1966 = vmatmul.mubr.msk.f32.vlgmr.msra.gmra.mrb[4].mxu0 %vm293_vm2, %v1770_v35 }
 0x13b   :  { %1968 = vmatprep.mubr.msk.f32.mxu0 %vm293_vm2, %v1771_v36 }
 0x13e   :  { %1969 = vmatmul.mubr.msk.f32.gmra.mrb[6].mxu0 %vm293_vm2, %v1772_v37 }
 0x13f   :  { %1995 = vmatprep.mubr.msk.f32.mxu0 %vm293_vm2, %v888_v53 }
 0x20d   :  { %v1967_v40 = vpop.f32.mrb[4].mxu0 }
 0x20e   :  { %v692_v41 = vadd.f32 %v1967_v40, %v1777_v39  ;;  %v661_v42 = vpop.f32.mrb[5].mxu0  ;;  %v1320_v40 = vld [vmem:[#allocation6] sm:$0xff] }
 0x20f   :  { %v691_v43 = vadd.f32 %v1777_v39, %v661_v42  ;;  %v1644_v42 = vld [vmem:[#allocation6 + $0x20] sm:$0xff] }
 0x210   :  { %v696_v46 = vmax.f32 %v692_v41, 0.0  ;;  %v1321_v41 = vld [vmem:[#allocation6 + $0x8] sm:$0xf] }
 0x211   :  { %v695_v44 = vmax.f32 %v691_v43, 0.0  ;;  %v1970_v45 = vpop.f32.mrb[6].mxu0  ;;  %v1645_v43 = vld [vmem:[#allocation6 + $0x28] sm:$0xf] }
 0x212   :  { %v694_v47 = vadd.f32 %v1970_v45, %v1777_v39  ;;  %v671_v48 = vpop.f32.mrb[7].mxu0 }
 0x213   :  { %v693_v49 = vadd.f32 %v1777_v39, %v671_v48  ;;  %1973 = vmatprep.mubr.msk.f32.mxu1 %vm700_vm3, %v695_v44  ;;  %v1402_v39 = vld [vmem:[#allocation6 + $0x18] sm:$0xf] }
 0x214   :  { %1974 = vmatmul.mubr.msk.f32.vlgmr.msra.gmra.mrb[8].mxu1 %vm700_vm3, %v696_v46  ;;  %v698_v52 = vmax.f32 %v694_v47, 0.0 }
 0x215   :  { %v697_v51 = vmax.f32 %v693_v49, 0.0  ;;  %1980 = vmatpush3.msra.mxu1 %v801_v38 }
 0x216   :  { %2009 = vmatprep.subr.mxu1 %v1053_v50 }
 0x217   :  { %1976 = vmatprep.mubr.msk.f32.mxu1 %vm700_vm3, %v697_v51 }
 0x218   :  { %1977 = vmatmul.mubr.msk.f32.gmra.mrb[10].mxu1 %vm700_vm3, %v698_v52 }
 0x219   :  { %1981 = vmatprep.mubr.msk.f32.mxu1 %vm700_vm3, %v695_v44 }
 0x21c   :  { %1982 = vmatmul.mubr.msk.f32.vlgmr.msra.gmra.mrb[12].mxu1 %vm700_vm3, %v696_v46 }
 0x21d   :  { %1984 = vmatprep.mubr.msk.f32.mxu1 %vm700_vm3, %v697_v51  ;;  %2010 = vmatpush3.msra.mxu1 %v1053_v50 }
 0x21e   :  { %2119 = vmatprep.subr.bf16.mxu1 %v2118_v56 }
 0x220   :  { %1985 = vmatmul.mubr.msk.f32.gmra.mrb[14].mxu1 %vm700_vm3, %v698_v52 }
 0x221   :  { %2011 = vmatprep.mubr.msk.f32.mxu1 %vm700_vm3, %v695_v44 }
 0x224   :  { %2012 = vmatmul.mubr.msk.f32.vlgmr.msra.gmra.mrb[16].mxu1 %vm700_vm3, %v696_v46 }
 0x225   :  { %2014 = vmatprep.mubr.msk.f32.mxu1 %vm700_vm3, %v697_v51  ;;  %2121 = vmatpush3.bf16.msra.mxu1 %v2118_v56 }
 0x226   :  { %2123 = vmatprep.subr.bf16.mxu1 %v2122_v21 }
 0x228   :  { %2015 = vmatmul.mubr.msk.f32.gmra.mrb[18].mxu1 %vm700_vm3, %v698_v52 }
 0x2e7   :  { %v1975_v57 = vpop.f32.mrb[8].mxu1 }
 0x2e8   :  { %v779_v58 = vpop.f32.mrb[9].mxu1 }
 0x2e9   :  { %v2102_v59 = vpack.c.bf16 %v1975_v57, %v779_v58 }
 0x2eb   :  { %v1978_v60 = vpop.f32.mrb[10].mxu1 }
 0x2ec   :  { %v789_v61 = vpop.f32.mrb[11].mxu1 }
 0x2ed   :  { %v2106_v62 = vpack.c.bf16 %v1978_v60, %v789_v61 }
 0x2ef   :  { %v1983_v63 = vpop.f32.mrb[12].mxu1 }
 0x2f0   :  { %v868_v0 = vpop.f32.mrb[13].mxu1 }
 0x2f1   :  { %v2094_v1 = vpack.c.bf16 %v1983_v63, %v868_v0 }
 0x2f3   :  { %v1986_v2 = vpop.f32.mrb[14].mxu1  ;;  %2095 = vmatprep.subr.bf16.mxu0 %v2094_v1 }
 0x2f4   :  { %v878_v3 = vpop.f32.mrb[15].mxu1  ;;  %2097 = vmatpush3.bf16.msra.mxu0 %v2094_v1 }
 0x2f5   :  { %v2098_v4 = vpack.c.bf16 %v1986_v2, %v878_v3 }
 0x2f7   :  { %2099 = vmatprep.subr.bf16.mxu0 %v2098_v4  ;;  %v2013_v5 = vpop.f32.mrb[16].mxu1 }
 0x2f8   :  { %2101 = vmatpush3.bf16.msra.mxu0 %v2098_v4  ;;  %v1120_v6 = vpop.f32.mrb[17].mxu1 }
 0x2f9   :  { %v2110_v8 = vpack.c.bf16 %v2013_v5, %v1120_v6  ;;  %2103 = vmatprep.subr.bf16.mxu0 %v2102_v59 }
 0x2fb   :  { %1996 = vmatmul.mubr.msk.f32.vlgmr.msra.gmra.mrb[8].mxu0 %vm293_vm2, %v889_v7  ;;  %v2016_v10 = vpop.f32.mrb[18].mxu1 }
 0x2fc   :  { %2105 = vmatpush3.bf16.msra.mxu0 %v2102_v59  ;;  %v1130_v11 = vpop.f32.mrb[19].mxu1  ;;  %2006 = vmatprep.mubr.msk.f32.mxu0 %vm293_vm2, %v798_v9 }
 0x2fd   :  { %v2114_v12 = vpack.c.bf16 %v2016_v10, %v1130_v11  ;;  %2107 = vmatprep.subr.bf16.mxu0 %v2106_v62 }
 0x300   :  { %2109 = vmatpush3.bf16.msra.mxu0 %v2106_v62 }
 0x301   :  { %2111 = vmatprep.subr.bf16.mxu0 %v2110_v8 }
 0x303   :  { %2007 = vmatmul.mubr.msk.f32.vlgmr.msra.gmra.mrb[8].mxu0 %vm293_vm2, %v799_v13 }
 0x304   :  { %2113 = vmatpush3.bf16.msra.mxu0 %v2110_v8  ;;  %2025 = vmatprep.mubr.msk.f32.mxu0 %vm293_vm2, %v1140_v14 }
 0x305   :  { %2115 = vmatprep.subr.bf16.mxu0 %v2114_v12 }
 0x308   :  { %2117 = vmatpush3.bf16.msra.mxu0 %v2114_v12 }
 0x309   :  { %2135 = vmatprep.subr.bf16.mxu0 %v2134_v18 }
 0x30b   :  { %2026 = vmatmul.mubr.msk.f32.vlgmr.msra.gmra.mrb[8].mxu0 %vm293_vm2, %v1141_v15 }
 0x30c   :  { %2137 = vmatpush3.bf16.msra.mxu0 %v2134_v18 }
 0x3de   :  { %v2027_v23 = vpop.f32.mrb[8].mxu0 }
 0x3df   :  { %v1233_v24 = vadd.f32 %v2027_v23, %v1796_v22  ;;  %v1214_v25 = vpop.f32.mrb[9].mxu0 }
 0x3e0   :  { %v1232_v26 = vadd.f32 %v1796_v22, %v1214_v25 }
 0x3e1   :  { %v1235_v28 = vmax.f32 %v1233_v24, 0.0 }
 0x3e2   :  { %v1234_v27 = vmax.f32 %v1232_v26, 0.0 }
 0x3e4   :  { %2032 = vmatprep.mubr.msk.f32.mxu1 %vm1238_vm4, %v1234_v27  ;;  %2060 = vmatprep.mubr.msk.f32.mxu0 %vm1238_vm4, %v1234_v27 }
 0x3e5   :  { %2033 = vmatmul.mubr.msk.f32.vlgmr.msra.gmra.mrb[20].mxu1 %vm1238_vm4, %v1235_v28  ;;  %2061 = vmatmul.mubr.msk.f32.vlgmr.msra.gmra.mrb[10].mxu0 %vm1238_vm4, %v1235_v28 }
 0x3e6   :  { %2125 = vmatpush3.bf16.msra.mxu1 %v2122_v21  ;;  %2039 = vmatprep.mubr.msk.f32.mxu1 %vm1238_vm4, %v1234_v27 }
 0x3e9   :  { %2040 = vmatmul.mubr.msk.f32.vlgmr.msra.gmra.mrb[22].mxu1 %vm1238_vm4, %v1235_v28 }
 0x3ea   :  { %2046 = vmatprep.mubr.msk.f32.mxu1 %vm1238_vm4, %v1401_v29 }
 0x4b8   :  { %v2034_v30 = vpop.f32.mrb[20].mxu1  ;;  %v2062_v31 = vpop.f32.mrb[10].mxu0 }
 0x4b9   :  { %v1311_v32 = vpop.f32.mrb[21].mxu1  ;;  %v1634_v33 = vpop.f32.mrb[11].mxu0 }
 0x4ba   :  { %v2130_v34 = vpack.c.bf16 %v2034_v30, %v1311_v32  ;;  %v2138_v35 = vpack.c.bf16 %v2062_v31, %v1634_v33 }
 0x4bc   :  { %v2041_v36 = vpop.f32.mrb[22].mxu1 }
 0x4bd   :  { %v1391_v37 = vpop.f32.mrb[23].mxu1 }
 0x4be   :  { %v2126_v38 = vpack.c.bf16 %v2041_v36, %v1391_v37 }
 0x4c0   :  { %2127 = vmatprep.subr.bf16.mxu1 %v2126_v38 }
 0x4c1   :  { %2129 = vmatpush3.bf16.msra.mxu1 %v2126_v38 }
 0x4c2   :  { %2131 = vmatprep.subr.bf16.mxu1 %v2130_v34 }
 0x4c4   :  { %2047 = vmatmul.mubr.msk.f32.vlgmr.msra.gmra.mrb[24].mxu1 %vm1238_vm4, %v1402_v39 }
 0x4c5   :  { %2133 = vmatpush3.bf16.msra.mxu1 %v2130_v34  ;;  %2053 = vmatprep.mubr.msk.f32.mxu1 %vm1238_vm4, %v1320_v40 }
 0x4c6   :  { %2139 = vmatprep.subr.bf16.mxu1 %v2138_v35 }
 0x4cc   :  { %2054 = vmatmul.mubr.msk.f32.vlgmr.msra.gmra.mrb[24].mxu1 %vm1238_vm4, %v1321_v41 }
 0x4cd   :  { %2141 = vmatpush3.bf16.msra.mxu1 %v2138_v35  ;;  %2067 = vmatprep.mubr.msk.f32.mxu1 %vm1238_vm4, %v1644_v42 }
 0x4d4   :  { %2068 = vmatmul.mubr.msk.f32.vlgmr.msra.gmra.mrb[24].mxu1 %vm1238_vm4, %v1645_v43 }
 0x5a7   :  { %v2069_v44 = vpop.f32.mrb[24].mxu1 }
 0x5a8   :  { %1732 = vst.msk [vmem:[%s2526_s9 + $0x8] sm:$0xf] %vm1731_vm5, %v2069_v44  ;;  %v1718_v45 = vpop.f32.mrb[25].mxu1 }
 0x5a9   :  { %1730 = vst.msk [vmem:[%s2526_s9] sm:$0xff] %vm1729_vm6, %v1718_v45 }
 0x5aa   :  { %1737 = vsyncpa [#allocation3], 1 }
 0x5ab   :  { %1738 = vsyncpa [#allocation5], 1 }
 0x5ac   :  { %1739 = vsyncpa [#allocation8], 1 }

</bundles_post_ra>
